<compile_context>
chip_gen: v7x
topology: tpu7x:2x2x1
jax: 0.10.0
libtpu: 0.0.40
codegen_flags: <defaults>
</compile_context>

<pallas_src>
import numpy as np
import jax
import jax.numpy as jnp
from jax import lax
from jax.experimental import pallas as pl
from jax.experimental.pallas import tpu as pltpu


# ----------------------------------------------------------------------------- VMEM accounting
def _vmem_budget():
    """Generation-aware per-kernel VMEM budget (v5e/v6e: ~96 MiB, v7x: ~48 MiB)."""
    try:
        cap = int(pltpu.get_tpu_info().vmem_capacity_bytes)
    except Exception:
        cap = 64 * 2**20          # conservative fallback (v7x per-TensorCore)
    return max(int(cap * 0.75), 24 * 2**20)


def _pad_up(n, m):
    return ((n + m - 1) // m) * m


def _tile_bytes(shape, itemsize):
    """VMEM bytes of one buffer, including (sublane, lane) padding."""
    shape = tuple(int(s) for s in shape)
    if not shape:
        return 4 * 128
    lane = _pad_up(shape[-1], 128)
    if len(shape) == 1:
        return lane * itemsize
    sub_mult = max(8, 32 // itemsize)           # 8 sublanes f32, 16 bf16
    sub = _pad_up(shape[-2], sub_mult)
    lead = 1
    for s in shape[:-2]:
        lead *= s
    return lead * sub * lane * itemsize


def _proj_vmem_bytes(th, H, W, C, C8):
    """Padded per-step VMEM footprint of the kv-projection kernel."""
    P = C + C8
    b = 0
    b += 2 * _tile_bytes((th, W, C), 2)                     # y tile (bf16, dbl-buf)
    b += 2 * _tile_bytes((th, W, P), 2)                     # kv row out (dbl-buf)
    b += 2 * _tile_bytes((W, th, P), 2)                     # kv col out (dbl-buf)
    b += 2 * (_tile_bytes((C, P), 2) + _tile_bytes((1, P), 4))
    b += _tile_bytes((th * W, P), 4)                        # f32 matmul result
    b += _tile_bytes((th, W, P), 2) + _tile_bytes((W, th, P), 2)   # casts / swap
    return b


def _attn_vmem_bytes(th, H, W, C, C8):
    """Padded per-step VMEM footprint of the attention kernel."""
    P = C + C8
    b = 0
    # streamed, double-buffered blocks
    b += 2 * _tile_bytes((th, W, C), 2)                     # x tile (bf16)
    b += 2 * _tile_bytes((th, W, P), 2)                     # packed kv row tile
    b += 2 * _tile_bytes((th, W, C), 4)                     # f32 output tile
    # resident packed column strip (default buffering -> count it twice)
    b += 2 * _tile_bytes((W, H, P), 2)
    # weights / bias
    b += 2 * (_tile_bytes((C, C8), 2) + _tile_bytes((1, C8), 4))
    # in-kernel intermediates
    b += 2 * _tile_bytes((th * W, C8), 4)                   # q row / col (f32)
    b += 2 * _tile_bytes((th, W, C8), 2)                    # bf16 copies of q
    b += 2 * _tile_bytes((th, W, W), 4) + _tile_bytes((th, W, W), 2)   # e_w/p_w/att_w
    b += 2 * _tile_bytes((W, th, H), 4) + _tile_bytes((W, th, H), 2)   # e_h/p_h/att_h
    b += 2 * _tile_bytes((th, W, C), 4) + _tile_bytes((W, th, C), 4)   # out_w/out_h
    b += 8 * _tile_bytes((th, W), 4)                        # softmax stats
    return b


def _choose_tile_h(H, W, C, C8, budget, bytes_fn, prefer_multi):
    """Largest sublane-aligned row tile fitting `budget`.

    With prefer_multi=True, prefers >= 2 tiles per image so the h axis actually
    pipelines and (on v7x, B==1) both TensorCores get work."""
    cands = [d for d in range(H, 0, -1)
             if H % d == 0 and (d % 8 == 0 or d == H)]
    pref = ([d for d in cands if H // d >= 2] or cands) if prefer_multi else cands
    fitting = [d for d in pref if bytes_fn(d, H, W, C, C8) <= budget]
    return fitting[0] if fitting else cands[-1]


# ----------------------------------------------------------------------------- kernels
def _kv_proj_kernel(y_ref, wkv_ref, bkv_ref, kvr_ref, kvc_ref):
    """Fused 1x1-conv k/v projection; packed [v | k] outputs in both layouts.

    y_ref   : (1, THp, W, C)      bf16  key/value features tile
    wkv_ref : (C, C+C8)           bf16  packed [wv | wk]
    bkv_ref : (1, C+C8)           f32   packed [bv | bk]
    kvr_ref : (1, THp, W, C+C8)   bf16  packed kv, row layout
    kvc_ref : (1, W, THp, C+C8)   bf16  packed kv, column layout
    """
    th, W, C = y_ref.shape[1], y_ref.shape[2], y_ref.shape[3]
    P = kvr_ref.shape[3]
    # NOTE: the reshape folds THp into the sublane dim; correct for any W,
    # cheapest when W is a multiple of the bf16 sublane count (16).
    kv = jnp.dot(y_ref[0].reshape(th * W, C), wkv_ref[...],
                 preferred_element_type=jnp.float32) + bkv_ref[...]
    kv = kv.reshape(th, W, P).astype(kvr_ref.dtype)
    kvr_ref[0] = kv
    kvc_ref[0] = jnp.swapaxes(kv, 0, 1)          # tile-local XLU swap, no HBM pass


def _cc_attn_kernel(x_ref, kvr_ref, kvc_ref, wq_ref, bq_ref, gamma_ref, o_ref):
    """One (batch, query-row-tile) step of criss-cross cross-attention.

    x_ref   : (1, TH, W, C)      bf16  query-side features (residual source)
    kvr_ref : (1, TH, W, C+C8)   bf16  packed [v | k], row layout (this tile)
    kvc_ref : (1, W, H, C+C8)    bf16  packed [v | k], column layout (resident)
    gamma_ref : (1,)             f32   SMEM scalar
    o_ref   : (1, TH, W, C)      f32   x + gamma * (out_W + out_H)
    """
    th, W, C = x_ref.shape[1], x_ref.shape[2], x_ref.shape[3]
    H = kvc_ref.shape[2]
    C8 = wq_ref.shape[1]
    t = pl.program_id(1)

    x = x_ref[0]                                   # (TH, W, C) bf16
    gamma = gamma_ref[0]                           # scalar from SMEM

    # q projection: 1x1 conv == per-pixel matmul over channels (bf16 MXU, f32 acc)
    q = jnp.dot(x.reshape(th * W, C), wq_ref[...],
                preferred_element_type=jnp.float32) + bq_ref[...]
    q_row = q.reshape(th, W, C8)
    q_row_b = q_row.astype(jnp.bfloat16)                    # (TH, W, C8)
    q_col_b = jnp.swapaxes(q_row, 0, 1).astype(jnp.bfloat16)  # (W, TH, C8)

    # unpack the lane-dense kv tensors (static slices; k slice is narrow but
    # never round-trips HBM on its own anymore)
    kv_row = kvr_ref[0]                            # (TH, W, C+C8)
    v_row, k_row = kv_row[..., :C], kv_row[..., C:]
    kv_col = kvc_ref[0]                            # (W, H, C+C8)
    v_col, k_col = kv_col[..., :C], kv_col[..., C:]

    # width branch:  e_w[i, w, w'] = <q(i, w), k(i, w')>
    e_w = jnp.einsum('iwd,ivd->iwv', q_row_b, k_row,
                     preferred_element_type=jnp.float32)    # (TH, W, W)
    # height branch: e_h[w, i, h'] = <q(i, w), k(h', w)>
    e_h = jnp.einsum('wid,whd->wih', q_col_b, k_col,
                     preferred_element_type=jnp.float32)    # (W, TH, H)

    # CCNet "INF" mask: -inf where the key row equals the (global) query row.
    row_id = lax.broadcasted_iota(jnp.int32, (th, H), 0) + t * th
    col_id = lax.broadcasted_iota(jnp.int32, (th, H), 1)
    e_h = jnp.where((row_id == col_id)[None, :, :], -jnp.inf, e_h)

    # joint softmax over the concatenated (H + W) axis, f32, no explicit concat
    m_w = jnp.max(e_w, axis=-1)                               # (TH, W)
    m_h = jnp.max(e_h, axis=-1)                               # (W, TH)
    m = jnp.maximum(m_w, m_h.T)                               # (TH, W)
    p_w = jnp.exp(e_w - m[:, :, None])                        # (TH, W, W)
    p_h = jnp.exp(e_h - m.T[:, :, None])                      # (W, TH, H)
    denom = jnp.sum(p_w, axis=-1) + jnp.sum(p_h, axis=-1).T   # (TH, W)
    inv = pl.reciprocal(denom, approx=True)                   # EUP, not VALU

    att_w = (p_w * inv[:, :, None]).astype(jnp.bfloat16)      # (TH, W, W)
    att_h = (p_h * inv.T[:, :, None]).astype(jnp.bfloat16)    # (W, TH, H)

    out_w = jnp.einsum('iwv,ivc->iwc', att_w, v_row,
                       preferred_element_type=jnp.float32)    # (TH, W, C)
    out_h = jnp.einsum('wih,whc->wic', att_h, v_col,
                       preferred_element_type=jnp.float32)    # (W, TH, C)
    # epilogue relayout on bf16 data (half the XLU/VMEM bytes of an f32 swap)
    out_h = jnp.swapaxes(out_h.astype(jnp.bfloat16), 0, 1).astype(jnp.float32)

    o_ref[0] = (x.astype(jnp.float32) + gamma * (out_w + out_h)).astype(o_ref.dtype)


# ----------------------------------------------------------------------------- wrapper
def criss_cross_attention(x_nchw, y_nchw, p):
    """One CrissCrossAttention level. x, y: (B, C, H, W) NCHW -> (B, C, H, W)."""
    B, C, H, W = x_nchw.shape
    C8 = p['wq'].shape[1]
    P = C + C8
    bf16 = jnp.bfloat16
    budget = _vmem_budget()

    def _vmem_limit(est):
        return int(min(max(budget, est + (8 << 20)), 100 * 2**20))

    # NCHW -> NHWC glue (channels last -> vector lanes); stream in bf16.
    x = jnp.transpose(x_nchw, (0, 2, 3, 1)).astype(bf16)     # (B, H, W, C)
    y = jnp.transpose(y_nchw, (0, 2, 3, 1)).astype(bf16)

    # packed [wv | wk] projection weights: one wide MXU matmul per tile
    wkv = jnp.concatenate([p['wv'], p['wk']], axis=1).astype(bf16)           # (C, P)
    bkv = jnp.concatenate([p['bv'], p['bk']]).reshape(1, P).astype(jnp.float32)
    wq = p['wq'].astype(bf16)
    bq = p['bq'].reshape(1, C8).astype(jnp.float32)
    gamma = p['gamma'].reshape(1).astype(jnp.float32)

    # ---- pass 1: fused kv projection, packed row + column layouts -----------
    THp = _choose_tile_h(H, W, C, C8, budget, _proj_vmem_bytes, prefer_multi=False)
    proj_cost = pl.CostEstimate(
        flops=2 * B * H * W * C * P,
        transcendentals=0,
        bytes_accessed=B * H * W * (2 * C + 4 * P))
    kv_row, kv_col = pl.pallas_call(
        _kv_proj_kernel,
        out_shape=(jax.ShapeDtypeStruct((B, H, W, P), bf16),
                   jax.ShapeDtypeStruct((B, W, H, P), bf16)),
        grid=(B, H // THp),
        in_specs=[pl.BlockSpec((1, THp, W, C), lambda b, t: (b, t, 0, 0)),
                  pl.BlockSpec((C, P), lambda b, t: (0, 0)),
                  pl.BlockSpec((1, P), lambda b, t: (0, 0))],
        out_specs=(pl.BlockSpec((1, THp, W, P), lambda b, t: (b, t, 0, 0)),
                   pl.BlockSpec((1, W, THp, P), lambda b, t: (b, 0, t, 0))),
        compiler_params=pltpu.CompilerParams(
            dimension_semantics=("parallel", "parallel"),
            vmem_limit_bytes=_vmem_limit(_proj_vmem_bytes(THp, H, W, C, C8))),
        cost_estimate=proj_cost,
    )(y, wkv, bkv)

    # ---- pass 2: criss-cross attention, tiled over query rows ----------------
    TH = _choose_tile_h(H, W, C, C8, budget, _attn_vmem_bytes, prefer_multi=True)
    nth = H // TH
    attn_cost = pl.CostEstimate(
        flops=2 * B * H * W * (C * C8 + (W + H) * (C8 + C)),
        transcendentals=B * H * W * (W + H),
        bytes_accessed=B * H * W * (2 * C + 2 * P + 4 * C) + B * W * H * 2 * P)
    out_nhwc = pl.pallas_call(
        _cc_attn_kernel,
        out_shape=jax.ShapeDtypeStruct((B, H, W, C), jnp.float32),
        grid=(B, nth),
        in_specs=[pl.BlockSpec((1, TH, W, C), lambda b, t: (b, t, 0, 0)),   # x tile
                  pl.BlockSpec((1, TH, W, P), lambda b, t: (b, t, 0, 0)),   # kv row tile
                  pl.BlockSpec((1, W, H, P), lambda b, t: (b, 0, 0, 0)),    # kv col strip (resident)
                  pl.BlockSpec((C, C8), lambda b, t: (0, 0)),               # wq
                  pl.BlockSpec((1, C8), lambda b, t: (0, 0)),               # bq
                  pl.BlockSpec(memory_space=pltpu.MemorySpace.SMEM)],       # gamma (scalar)
        out_specs=pl.BlockSpec((1, TH, W, C), lambda b, t: (b, t, 0, 0)),
        compiler_params=pltpu.CompilerParams(
            dimension_semantics=("parallel", "parallel"),
            vmem_limit_bytes=_vmem_limit(_attn_vmem_bytes(TH, H, W, C, C8))),
        cost_estimate=attn_cost,
    )(x, kv_row, kv_col, wq, bq, gamma)

    return jnp.transpose(out_nhwc, (0, 3, 1, 2))    # back to NCHW


def sa_criss_after_fpn(fpn_features1, fpn_features2, params):
    """Equivalent of SA_Criss_after_FPN.forward (h / dropout args are unused there)."""
    return tuple(criss_cross_attention(f1, f2, p)
                 for f1, f2, p in zip(fpn_features1, fpn_features2, params))


# ----------------------------------------------------------------------------- params
def init_sa_criss_params(fpn_out_channels, key):
    params = []
    for idx, C in enumerate(fpn_out_channels):
        C8 = max(C // 8, 1)
        k = jax.random.fold_in(key, idx)
        ks = jax.random.split(k, 6)

        def u(kk, shape, fan_in):
            bound = 1.0 / np.sqrt(fan_in)
            return jax.random.uniform(kk, shape, jnp.float32, -bound, bound)

        params.append({
            'wq': u(ks[0], (C, C8), C), 'bq': u(ks[1], (C8,), C),
            'wk': u(ks[2], (C, C8), C), 'bk': u(ks[3], (C8,), C),
            'wv': u(ks[4], (C, C), C),  'bv': u(ks[5], (C,), C),
            # original CCNet inits gamma = 0; use 0.5 so the attention path matters
            'gamma': jnp.full((1,), 0.5, jnp.float32),
        })
    return params


# ----------------------------------------------------------------------------- pure-JAX reference
def criss_cross_ref(x, y, p):
    """Reference following the PyTorch CrissCrossAttention math (NCHW, f32)."""
    B, C, H, W = x.shape
    x = x.astype(jnp.float32)
    y = y.astype(jnp.float32)
    q = jnp.einsum('bchw,cd->bdhw', x, p['wq']) + p['bq'][None, :, None, None]
    k = jnp.einsum('bchw,cd->bdhw', y, p['wk']) + p['bk'][None, :, None, None]
    v = jnp.einsum('bchw,cd->bdhw', y, p['wv']) + p['bv'][None, :, None, None]

    energy_H = jnp.einsum('bdhw,bdgw->bhwg', q, k)          # (B,H,W,H)
    diag = jnp.arange(H)[:, None] == jnp.arange(H)[None, :]
    energy_H = jnp.where(diag[None, :, None, :], -jnp.inf, energy_H)
    energy_W = jnp.einsum('bdhw,bdhg->bhwg', q, k)          # (B,H,W,W)

    att = jax.nn.softmax(jnp.concatenate([energy_H, energy_W], axis=-1), axis=-1)
    att_H, att_W = att[..., :H], att[..., H:]

    out_H = jnp.einsum('bhwg,bdgw->bdhw', att_H, v)
    out_W = jnp.einsum('bhwg,bdhg->bdhw', att_W, v)
    return p['gamma'][0] * (out_H + out_W) + x


# ----------------------------------------------------------------------------- main
if __name__ == "__main__":
    key = jax.random.PRNGKey(0)
    fpn_out_channels = (16, 32)
    spatial = ((16, 16), (8, 8))     # level 1 runs with 2 row tiles, level 2 with 1
    B = 2

    params = init_sa_criss_params(fpn_out_channels, jax.random.fold_in(key, 1000))

    feats1, feats2 = [], []
    for i, (C, (H, W)) in enumerate(zip(fpn_out_channels, spatial)):
        k1, k2 = jax.random.split(jax.random.fold_in(key, i), 2)
        feats1.append(jax.random.normal(k1, (B, C, H, W), jnp.float32))
        feats2.append(jax.random.normal(k2, (B, C, H, W), jnp.float32))

    outs = sa_criss_after_fpn(tuple(feats1), tuple(feats2), params)
    outs = jax.block_until_ready(outs)

    # Numerical check vs. an f32 pure-JAX reference of the PyTorch forward.
    # bf16 streaming of x/y + bf16 MXU operands + the approx EUP reciprocal put
    # the expected max abs error at a few e-2 (documented precision deviation).
    for f1, f2, p, o in zip(feats1, feats2, params, outs):
        r = criss_cross_ref(f1, f2, p)
        assert o.shape == f1.shape, (o.shape, f1.shape)
        max_err = float(jnp.max(jnp.abs(o - r)))
        mean_err = float(jnp.mean(jnp.abs(o - r)))
        assert max_err < 8e-2 and mean_err < 1e-2, (max_err, mean_err)

    print("KERNEL_OK")
</pallas_src>

<mosaic_0001>
module attributes {stable_mosaic.version = 11 : i64} {
  func.func @_kv_proj_kernel(%arg0: i32, %arg1: i32, %arg2: memref<1x16x16x16xbf16, #tpu.memory_space<vmem>>, %arg3: memref<16x18xbf16, #tpu.memory_space<vmem>>, %arg4: memref<1x18xf32, #tpu.memory_space<vmem>>, %arg5: memref<1x16x16x18xbf16, #tpu.memory_space<vmem>>, %arg6: memref<1x16x16x18xbf16, #tpu.memory_space<vmem>>) attributes {dimension_semantics = [#tpu.dimension_semantics<parallel>, #tpu.dimension_semantics<parallel>], iteration_bounds = array<i64: 2, 1>, scalar_prefetch = 0 : i64, scratch_operands = 0 : i64, tpu.core_type = #tpu.core_type<tc>, window_params = [{transform_indices = @transform_0, window_bounds = array<i64: 1, 16, 16, 16>}, {pipeline_mode = #tpu.pipeline_mode<synchronous>, transform_indices = @transform_1, window_bounds = array<i64: 16, 18>}, {pipeline_mode = #tpu.pipeline_mode<synchronous>, transform_indices = @transform_2, window_bounds = array<i64: 1, 18>}, {transform_indices = @transform_3, window_bounds = array<i64: 1, 16, 16, 18>}, {transform_indices = @transform_4, window_bounds = array<i64: 1, 16, 16, 18>}]} {
    %c0 = arith.constant 0 : index
    %c0_0 = arith.constant 0 : index
    %c0_1 = arith.constant 0 : index
    %c0_2 = arith.constant 0 : index
    %0 = vector.load %arg2[%c0, %c0_0, %c0_1, %c0_2] : memref<1x16x16x16xbf16, #tpu.memory_space<vmem>>, vector<1x16x16x16xbf16>
    %1 = vector.shape_cast %0 : vector<1x16x16x16xbf16> to vector<16x16x16xbf16>
    %2 = vector.shape_cast %1 : vector<16x16x16xbf16> to vector<256x16xbf16>
    %c0_3 = arith.constant 0 : index
    %c0_4 = arith.constant 0 : index
    %3 = vector.load %arg3[%c0_3, %c0_4] : memref<16x18xbf16, #tpu.memory_space<vmem>>, vector<16x18xbf16>
    %cst = arith.constant dense<0.000000e+00> : vector<256x18xf32>
    %4 = tpu.matmul %2, %3, %cst {dimension_numbers = #tpu.dot_dimension_numbers<[1], [0], [0], [1], [0, 0, 1, 1], [], []>} : vector<256x16xbf16>, vector<16x18xbf16>, vector<256x18xf32> -> vector<256x18xf32>
    %c0_5 = arith.constant 0 : index
    %c0_6 = arith.constant 0 : index
    %5 = vector.load %arg4[%c0_5, %c0_6] : memref<1x18xf32, #tpu.memory_space<vmem>>, vector<1x18xf32>
    %6 = vector.broadcast %5 : vector<1x18xf32> to vector<256x18xf32>
    %7 = arith.addf %4, %6 : vector<256x18xf32>
    %8 = vector.shape_cast %7 : vector<256x18xf32> to vector<16x16x18xf32>
    %9 = arith.truncf %8 : vector<16x16x18xf32> to vector<16x16x18xbf16>
    %c0_7 = arith.constant 0 : index
    %c0_8 = arith.constant 0 : index
    %c0_9 = arith.constant 0 : index
    %c0_10 = arith.constant 0 : index
    %10 = vector.load %arg5[%c0_7, %c0_8, %c0_9, %c0_10] : memref<1x16x16x18xbf16, #tpu.memory_space<vmem>>, vector<1x16x16x18xbf16>
    %11 = vector.shape_cast %10 : vector<1x16x16x18xbf16> to vector<16x16x18xbf16>
    %12 = vector.shape_cast %9 : vector<16x16x18xbf16> to vector<1x16x16x18xbf16>
    tpu.vector_store %arg5[%c0_7, %c0_8, %c0_9, %c0_10], %12 {strides = array<i32>} : memref<1x16x16x18xbf16, #tpu.memory_space<vmem>>, vector<1x16x16x18xbf16>,
    %13 = tpu.transpose %9, [1, 0, 2] : vector<16x16x18xbf16> -> vector<16x16x18xbf16>
    %c0_11 = arith.constant 0 : index
    %c0_12 = arith.constant 0 : index
    %c0_13 = arith.constant 0 : index
    %c0_14 = arith.constant 0 : index
    %14 = vector.load %arg6[%c0_11, %c0_12, %c0_13, %c0_14] : memref<1x16x16x18xbf16, #tpu.memory_space<vmem>>, vector<1x16x16x18xbf16>
    %15 = vector.shape_cast %14 : vector<1x16x16x18xbf16> to vector<16x16x18xbf16>
    %16 = vector.shape_cast %13 : vector<16x16x18xbf16> to vector<1x16x16x18xbf16>
    tpu.vector_store %arg6[%c0_11, %c0_12, %c0_13, %c0_14], %16 {strides = array<i32>} : memref<1x16x16x18xbf16, #tpu.memory_space<vmem>>, vector<1x16x16x18xbf16>,
    return
  }
  func.func @transform_0(%arg0: i32, %arg1: i32) -> (i32, i32, i32, i32) {
    %c0_i32 = arith.constant 0 : i32
    %c0_i32_0 = arith.constant 0 : i32
    %c0_i32_1 = arith.constant 0 : i32
    return %arg0, %arg1, %c0_i32, %c0_i32_0 : i32, i32, i32, i32
  }
  func.func @transform_1(%arg0: i32, %arg1: i32) -> (i32, i32) {
    %c0_i32 = arith.constant 0 : i32
    %c0_i32_0 = arith.constant 0 : i32
    %c0_i32_1 = arith.constant 0 : i32
    return %c0_i32, %c0_i32_0 : i32, i32
  }
  func.func @transform_2(%arg0: i32, %arg1: i32) -> (i32, i32) {
    %c0_i32 = arith.constant 0 : i32
    %c0_i32_0 = arith.constant 0 : i32
    %c0_i32_1 = arith.constant 0 : i32
    return %c0_i32, %c0_i32_0 : i32, i32
  }
  func.func @transform_3(%arg0: i32, %arg1: i32) -> (i32, i32, i32, i32) {
    %c0_i32 = arith.constant 0 : i32
    %c0_i32_0 = arith.constant 0 : i32
    %c0_i32_1 = arith.constant 0 : i32
    return %arg0, %arg1, %c0_i32, %c0_i32_0 : i32, i32, i32, i32
  }
  func.func @transform_4(%arg0: i32, %arg1: i32) -> (i32, i32, i32, i32) {
    %c0_i32 = arith.constant 0 : i32
    %c0_i32_0 = arith.constant 0 : i32
    %c0_i32_1 = arith.constant 0 : i32
    return %arg0, %c0_i32, %arg1, %c0_i32_0 : i32, i32, i32, i32
  }
}

</mosaic_0001>

<bundles_post_ra>
// kernel: tpu_custom_call.1
= control target key start
LH: loop header
LB: loop body
LE: loop exit
PB: predicated region body
PF: predicated region fallthrough
CT: control target
= control target key end

     0   :  { %10 = vsyncpa [#allocation3], 0  ;;  %s2566_s0 = inlined_call_operand.hbm [shape: bf16[2,16,16,16], index: 0, kind: input, shape index: {}]   ;;  %s2567_s1 = inlined_call_operand.hbm [shape: bf16[16,18], index: 1, kind: input, shape index: {}]   ;;  %s2568_s2 = inlined_call_operand.vmem [shape: f32[1,18], index: 2, kind: input, shape index: {}]   ;;  %s2569_s3 = inlined_call_operand.hbm [shape: bf16[2,16,16,18], index: 3, kind: output, shape index: {0}]   ;;  %s2570_s4 = inlined_call_operand.hbm [shape: bf16[2,16,16,18], index: 4, kind: output, shape index: {1}]  }
   0x1   :  { %12 = vsyncpa [#allocation3 + $0x1], 0 }
   0x2   :  { %13 = vsyncpa [#allocation6], 0 }
   0x3   :  { %14 = vsyncpa [#allocation4], 0 }
   0x4   :  { %16 = vsyncpa [#allocation4 + $0x1], 0 }
   0x5   :  { %17 = vsyncpa [#allocation9], 0 }
   0x6   :  { %19 = vsyncpa [#allocation9 + $0x1], 0  ;;  %s1922_s15 = smov 0   ;;  %s1924_s16 = smov 0  }
   0x7   :  { %s1926_s17 = smov 0   ;;  %s1928_s18 = smov 0  }
   0x8   :  { %s1930_s19 = smov 0   ;;  %s1932_s20 = smov 0  }
   0x9 LB: > { %s1385_s21 = sadd.s32 4294967295, %s1885_s20   ;;  %s1386_s22 = sadd.s32 4294967294, %s1885_s20   ;;  %s1885_s20 = sphi %s1932_s20, %s25_s20   ;;  %s1881_s19 = sphi %s1930_s19, %s2594_s19   ;;  %s1877_s18 = sphi %s1928_s18, %s2593_s18   ;;  %s1873_s17 = sphi %s1926_s17, %s2592_s17   ;;  %s1869_s16 = sphi %s1924_s16, %s2591_s16   ;;  %s1865_s15 = sphi %s1922_s15, %s2590_s15  }
   0xa   : > { %p59_p0 = scmp.ne.s32.totalorder %s1869_s16, %s1865_s15  ;;  %p1956_p1 = scmp.eq.s32.totalorder %s1385_s21, 0 }
   0xb   : > { %p1960_p2 = scmp.eq.s32.totalorder %s1385_s21, 1  ;;  %p133_p3 = scmp.eq.s32.totalorder %s1386_s22, 1 }
   0xc   : > { %s2575_s23 = scalar_select %p1956_p1, 1, 0 }
   0xd   : > { %s2576_s24 = scalar_select %p1960_p2, 1, 0 }
   0xe   : > { %p1966_p4 = por %p1956_p1, %p59_p0  ;;  %p1387_p5 = scmp.ge.s32.totalorder %s1885_s20, 1 }
   0xf   : > { %p1971_p6 = por %p133_p3, %p59_p0  ;;  %p168_p7 = scmp.lt.s32.totalorder %s1885_s20, 3 }
  0x10   : > { %s2577_s25 = scalar_select %p1966_p4, 1, 0 }
  0x11   : > { %s2578_s26 = scalar_select %p1971_p6, 1, 0 }
  0x12   : > { %p1976_p8 = pnand %p1387_p5, %p168_p7  ;;  %s1887_s28 = smov [#allocation5]  }
  0x13   : > { %s180_s29 = sshll.u32 %s1887_s28, 4  ;;  %s37_s5 = sadd.s32 1, %s1881_s19  ;;  %s181_s29 = int_to_ptr.vmem [resolvable:$true] %s180_s29 }
  0x14   : > { %s2579_s27 = scalar_select %p1976_p8, 1, 0 }
  0x15   : > { %p1618_p9 = pneg %p1976_p8  ;;  %s1709_s8 = scalar_lea.hbm %s2567_s1, 128 }
  0x16   : > { %p1710_p12 = scmp.ne.s32.totalorder %s2567_s1, %s1709_s8  ;;  %p1716_p5 = scmp.lt.u32.totalorder %s1709_s8, %s2567_s1 }
  0x17   : > { %p1985_p11 = pnand %p1618_p9, %p1956_p1 }
  0x19   : > { %p1711_p13 = pneg %p1985_p11 }
  0x1b   : > { %p1712_p0 = pnand %p1711_p13, %p1710_p12 }
  0x1d   : > { %p1713_p3 = pneg %p1712_p0 }
  0x1f   : > { %p1718_p7 = pnand %p1716_p5, %p1713_p3 }
  0x21   : > { %1721 = shalt.err (!%p1718_p7)
}
  0x22   : > { %s1722_s13 = scalar_lea.vmem %s181_s29, 128  ;;  %p1730_p1 = scmp.lt.s32.totalorder %s181_s29, %s181_s29 }
  0x23   : > { %p1723_p9 = scmp.ne.s32.totalorder %s181_s29, %s1722_s13  ;;  %p1731_p4 = scmp.lt.s32.totalorder %s1722_s13, %s1722_s13 }
  0x25   : > { %p1725_p10 = pnand %p1723_p9, %p1711_p13  ;;  %p1732_p8 = por %p1731_p4, %p1730_p1 }
  0x27   : > { %p1726_p6 = pneg %p1725_p10 }
  0x29   : > { %p1733_p2 = pnand %p1732_p8, %p1726_p6 }
  0x2b   : > { %1736 = shalt.err (!%p1733_p2)
}
  0x2c   : > { %s1888_s14 = smov 64   ;;  %s1889_s21 = smov 4  }
  0x2d   : > { %1621 = dma.hbm_to_vmem [thread:$0]  (!%p1985_p11), %s2567_s1, 128, %s181_s29, [#allocation6], %s1888_s14, %s1888_s14, %s1889_s21  }
  0x2e   : > { %p39_p1 = scmp.ge.s32.totalorder %s37_s5, 2  ;;  %s46_s6 = sadd.s32 1, %s1873_s17 }
  0x2f   : > { %p53_p2 = scmp.ne.s32.totalorder %s1873_s17, %s1869_s16  ;;  %p54_p4 = scmp.eq.s32.totalorder %s1885_s20, 0 }
  0x30   : > { %s2596_s5 = smov (%p39_p1, %s37_s5), 0  ;;  %p2582_p8 = scmp.ne.s32.totalorder %s2576_s24, 0 }
  0x31   : > { %p2015_p6 = por %p54_p4, %p53_p2  ;;  %s41_s8 = ssub.s32 %s1881_s19, %s2596_s5 }
  0x32   : > { %p2021_p10 = por %p2582_p8, %p53_p2  ;;  %p1634_p12 = scmp.lt.s32.totalorder %s1885_s20, 2 }
  0x33   : > { %p44_p11 = scmp.eq.s32.totalorder %s41_s8, 0  ;;  %s197_s29 = sand.u32 1, %s1873_s17  }
  0x34   : > { %s1390_s9 = sshll.u32 %s197_s29, 7  ;;  %s1520_s11 = sshll.u32 %s1881_s19, 11 }
  0x35   : > { %s2030_s10 = scalar_select %p44_p11, %s1873_s17, %s46_s6  }
  0x36   : > { %s2036_s22 = scalar_lea.hbm %s2566_s0, %s1520_s11  ;;  %s201_s24 = scalar_lea.vmem [#allocation2], %s1390_s9 }
  0x37   : > { %s211_s28 = sshll.u32 %s201_s24, 4  ;;  %p2042_p13 = pnand %p1634_p12, %p2015_p6  ;;  %s2038_s28 = int_to_ptr.vmem [resolvable:$true] %s211_s28 }
  0x38   : > { %s2046_s6 = scalar_lea.sflag [#allocation3], %s197_s29  ;;  %s1737_s12 = scalar_lea.hbm %s2036_s22, 2048 }
  0x39   : > { %p1738_p0 = scmp.ne.s32.totalorder %s2036_s22, %s1737_s12  ;;  %p1739_p3 = pneg %p2042_p13 }
  0x3a   : > { %s1742_s7 = scalar_lea.hbm %s2566_s0, 4096  ;;  %p1743_p9 = scmp.lt.u32.totalorder %s2036_s22, %s2566_s0 }
  0x3b   : > { %p1740_p5 = pnand %p1739_p3, %p1738_p0  ;;  %p1744_p1 = scmp.lt.u32.totalorder %s1742_s7, %s1737_s12 }
  0x3c   : > { %p1746_p4 = scmp.lt.u32.totalorder %s1737_s12, %s2036_s22 }
  0x3d   : > { %p1741_p7 = pneg %p1740_p5  ;;  %p1745_p2 = por %p1744_p1, %p1743_p9 }
  0x3f   : > { %p1747_p6 = por %p1746_p4, %p1745_p2 }
  0x41   : > { %p1748_p8 = pnand %p1747_p6, %p1741_p7 }
  0x43   : > { %1751 = shalt.err (!%p1748_p8)
}
  0x44   : > { %s1752_s29 = scalar_lea.vmem %s2038_s28, 2048  ;;  %s1890_s9 = smov [#allocation2]  }
  0x45   : > { %p1753_p12 = scmp.ne.s32.totalorder %s2038_s28, %s1752_s29  ;;  %s1757_s11 = sshll.u32 %s1890_s9, 4  ;;  %s1758_s11 = int_to_ptr.vmem [resolvable:$false] %s1757_s11 }
  0x46   : > { %s1759_s13 = scalar_lea.vmem %s1758_s11, 4096  ;;  %p1760_p5 = scmp.lt.s32.totalorder %s2038_s28, %s1758_s11 }
  0x47   : > { %p1755_p11 = pnand %p1753_p12, %p1739_p3  ;;  %p1761_p9 = scmp.lt.s32.totalorder %s1759_s13, %s1752_s29 }
  0x49   : > { %p1756_p0 = pneg %p1755_p11  ;;  %p1762_p1 = por %p1761_p9, %p1760_p5 }
  0x4b   : > { %p1763_p2 = pnand %p1762_p1, %p1756_p0 }
  0x4d   : > { %1766 = shalt.err (!%p1763_p2)
}
  0x4e   : > { %1625 = dma.hbm_to_vmem [thread:$0]  (!%p2042_p13), %s2036_s22, 2048, %s2038_s28, %s2046_s6, %s1888_s14, %s1888_s14, %s1889_s21  }
  0x4f   : > { %p2585_p3 = scmp.ne.s32.totalorder %s2579_s27, 0 }
  0x50   : > { %s2080_s12 = sand.u32 (!%p2585_p3), 1, %s1869_s16   ;;  %p2586_p7 = scmp.ne.s32.totalorder (!%p2585_p3), %s2577_s25, 0 }
  0x51   : > { %223 = sbr.rel (%p2585_p3) target bundleno = 406 (0x196), region = 32  ;;  %s2083_s7 = sshll.u32 (!%p2585_p3), %s2080_s12, 7 }
  0x52   : > { %s226_s8 = scalar_lea.sflag (!%p2585_p3), [#allocation3], %s2080_s12  ;;  %s2087_s24 = scalar_lea.vmem (!%p2585_p3), [#allocation2], %s2083_s7 }
  0x58   : > { %1848 = dma.done.wait (%p2586_p7), %s226_s8, 2048  }
  0x59   : > { %1850 = vsyncadd (%p2586_p7), %s226_s8, 4294965248  ;;  %p2587_p13 = scmp.ne.s32.totalorder %s2575_s23, 0 }
  0x5b   : > { %1852 = dma.done.wait (%p2587_p13), [#allocation6], 128  }
  0x5c   : > { %1854 = vsyncadd (%p2587_p13), [#allocation6], 4294967168  ;;  %v1692_v0 = vld [vmem:[#allocation5] sm:$0xff]   ;;  %vm394_vm0 = vcmask 130048   ;;  %v1695_v3 = vld [vmem:[%s2087_s24 + $0x8] sm:$0xff]   ;;  %vm732_vm1 = vcmask 142336  }
  0x5d   : > { %v1693_v1 = vld [vmem:[%s2087_s24] sm:$0xff]   ;;  %1572 = vmatprep.subr.bf16.mxu0 %v1692_v0  ;;  %1606 = vmatprep.subr.bf16.mxu1 %v1692_v0  ;;  %v1696_v4 = vld [vmem:[%s2087_s24 + $0x48] sm:$0xff]   ;;  %v1697_v5 = vld [vmem:[%s2087_s24 + $0x10] sm:$0xff]   ;;  %s2167_s27 = scalar_lea.vmem [#allocation7], %s2083_s7  ;;  %s2350_s14 = scalar_lea.vmem [#allocation8], %s2083_s7 }
  0x5e   : > { %v1694_v2 = vld [vmem:[%s2087_s24 + $0x40] sm:$0xff]   ;;  %1573 = vmatpush3.bf16.msra.mxu0 %v1692_v0  ;;  %1607 = vmatpush3.bf16.msra.mxu1 %v1692_v0  ;;  %v1698_v6 = vld [vmem:[%s2087_s24 + $0x50] sm:$0xff]   ;;  %v1699_v7 = vld [vmem:[%s2087_s24 + $0x18] sm:$0xff]   ;;  %v1891_v0 = vmov 1983009808   ;;  %s1553_s21 = sshll.u32 %s1877_s18, 11 }
  0x5f   : > { %1574 = vmatprep.mubr.msk.bf16.mxu0 %vm394_vm0, %v1693_v1  ;;  %1590 = vmatprep.mubr.msk.bf16.mxu1 %vm394_vm0, %v1694_v2  ;;  %v1700_v8 = vld [vmem:[%s2087_s24 + $0x58] sm:$0xff]   ;;  %v1701_v9 = vld [vmem:[%s2087_s24 + $0x20] sm:$0xff]   ;;  %v1703_v11 = vld [vmem:[%s2087_s24 + $0x28] sm:$0xff]   ;;  %v768_v1 = vunpack.c.l.s4 %v1891_v0  ;;  %v770_v2 = vlaneseq  ;;  %s1235_s22 = sshll.u32 %s2167_s27, 4  ;;  %s2391_s29 = scalar_lea.hbm %s2569_s3, %s1553_s21  ;;  %s2393_s22 = int_to_ptr.vmem [resolvable:$true] %s1235_s22 }
  0x60   : > { %v1702_v10 = vld [vmem:[%s2087_s24 + $0x60] sm:$0xff]   ;;  %v1704_v12 = vld [vmem:[%s2087_s24 + $0x68] sm:$0xff]   ;;  %v1705_v13 = vld [vmem:[%s2087_s24 + $0x30] sm:$0xff]   ;;  %s1214_s9 = scalar_lea.sflag [#allocation4], %s2080_s12  ;;  %s1767_s11 = scalar_lea.vmem %s2393_s22, 2048 }
  0x61   : > { %1575 = vmatmul.mubr.msk.bf16.vlgmr.msra.gmra.mrb[0].mxu0 %vm394_vm0, %v1695_v3  ;;  %1591 = vmatmul.mubr.msk.bf16.vlgmr.msra.gmra.mrb[0].mxu1 %vm394_vm0, %v1696_v4  ;;  %v1706_v14 = vld [vmem:[%s2087_s24 + $0x70] sm:$0xff]   ;;  %v1707_v15 = vld [vmem:[%s2087_s24 + $0x38] sm:$0xff]   ;;  %v2132_v17 = vld [vmem:[%s2568_s2] ss:$0 sm:$0xff]  ;;  %p1768_p4 = scmp.ne.s32.totalorder %s2393_s22, %s1767_s11  ;;  %s1893_s13 = smov [#allocation7]  }
  0x62   : > { %1578 = vmatprep.mubr.msk.bf16.mxu0 %vm394_vm0, %v1697_v5  ;;  %1594 = vmatprep.mubr.msk.bf16.mxu1 %vm394_vm0, %v1698_v6  ;;  %v1708_v16 = vld [vmem:[%s2087_s24 + $0x78] sm:$0xff]   ;;  %v1892_v5 = vmov 1934713408   ;;  %s1771_s7 = sshll.u32 %s1893_s13, 4  ;;  %s1772_s7 = int_to_ptr.vmem [resolvable:$false] %s1771_s7 }
  0x63   : > { %v832_v6 = vunpack.c.l.s4 %v1892_v5  ;;  %p1769_p6 = pnand %p1768_p4, %p2021_p10  ;;  %s1773_s8 = scalar_lea.vmem %s1772_s7, 4096 }
  0x64   : > { %p1774_p12 = scmp.lt.s32.totalorder %s2393_s22, %s1772_s7  ;;  %p1775_p11 = scmp.lt.s32.totalorder %s1773_s8, %s1767_s11 }
  0x65   : > { %p1770_p8 = pneg %p1769_p6 }
  0x66   : > { %p1776_p0 = por %p1775_p11, %p1774_p12 }
  0x68   : > { %p1777_p5 = pnand %p1776_p0, %p1770_p8 }
  0x69   : > { %1579 = vmatmul.mubr.msk.bf16.gmra.mrb[4].mxu0 %vm394_vm0, %v1699_v7  ;;  %1595 = vmatmul.mubr.msk.bf16.gmra.mrb[4].mxu1 %vm394_vm0, %v1700_v8 }
  0x6a   : > { %1582 = vmatprep.mubr.msk.bf16.mxu0 %vm394_vm0, %v1701_v9  ;;  %1598 = vmatprep.mubr.msk.bf16.mxu1 %vm394_vm0, %v1702_v10  ;;  %v769_v10 = vunpack.c.0.s8 %v768_v1 }
  0x71   : > { %1583 = vmatmul.mubr.msk.bf16.gmra.mrb[8].mxu0 %vm394_vm0, %v1703_v11  ;;  %1599 = vmatmul.mubr.msk.bf16.gmra.mrb[8].mxu1 %vm394_vm0, %v1704_v12  ;;  %v771_v11 = vshrl.u32 %v770_v2, 7 }
  0x72   : > { %1586 = vmatprep.mubr.msk.bf16.mxu0 %vm394_vm0, %v1705_v13  ;;  %1602 = vmatprep.mubr.msk.bf16.mxu1 %vm394_vm0, %v1706_v14 }
  0x79   : > { %1587 = vmatmul.mubr.msk.bf16.gmra.mrb[12].mxu0 %vm394_vm0, %v1707_v15  ;;  %1603 = vmatmul.mubr.msk.bf16.gmra.mrb[12].mxu1 %vm394_vm0, %v1708_v16 }
 0x134   : > { %v1576_v18 = vpop.f32.mrb[0].mxu0  ;;  %v1592_v19 = vpop.f32.mrb[0].mxu1 }
 0x135   : > { %v2135_v20 = vadd.f32 %v1576_v18, %v2132_v17  ;;  %v2138_v21 = vadd.f32 %v1592_v19, %v2132_v17  ;;  %v477_v22 = vpop.f32.mrb[1].mxu0  ;;  %v541_v23 = vpop.f32.mrb[1].mxu1 }
 0x136   : > { %v2141_v24 = vadd.f32 %v2132_v17, %v477_v22  ;;  %v2144_v25 = vadd.f32 %v2132_v17, %v541_v23  ;;  %v1577_v26 = vpop.f32.mrb[2].mxu0  ;;  %v1593_v27 = vpop.f32.mrb[2].mxu1  ;;  %v833_v22 = vunpack.c.0.s8 %v832_v6 }
 0x137   : > { %v1523_v28 = vpack.c.bf16 %v2135_v20, %v2135_v20  ;;  %v1539_v29 = vpack.c.bf16 %v2138_v21, %v2138_v21  ;;  %v2151_v30 = vadd.f32 %v1577_v26, %v2132_v17  ;;  %v2154_v31 = vadd.f32 %v1593_v27, %v2132_v17  ;;  %v480_v32 = vpop.f32.mrb[3].mxu0  ;;  %v544_v33 = vpop.f32.mrb[3].mxu1 }
 0x138   : > { %v1521_v34 = vpack.c.bf16 %v2141_v24, %v2141_v24  ;;  %v1537_v35 = vpack.c.bf16 %v2144_v25, %v2144_v25  ;;  %v2161_v36 = vadd.f32 %v2132_v17, %v480_v32  ;;  %v2164_v37 = vadd.f32 %v2132_v17, %v544_v33 }
 0x139   : > { %735 = vst.msk [vmem:[%s2167_s27 + $0x8] sm:$0xf] %vm732_vm1, %v1523_v28  ;;  %751 = vst.msk [vmem:[%s2167_s27 + $0x48] sm:$0xf] %vm732_vm1, %v1539_v29  ;;  %v1524_v38 = vpack.c.bf16 %v2151_v30, %v2151_v30  ;;  %v1540_v39 = vpack.c.bf16 %v2154_v31, %v2154_v31 }
 0x13a   : > { %733 = vst.msk [vmem:[%s2167_s27] sm:$0xf] %vm732_vm1, %v1521_v34  ;;  %749 = vst.msk [vmem:[%s2167_s27 + $0x40] sm:$0xf] %vm732_vm1, %v1537_v35  ;;  %v1522_v40 = vpack.c.bf16 %v2161_v36, %v2161_v36  ;;  %v1538_v41 = vpack.c.bf16 %v2164_v37, %v2164_v37 }
 0x13b   : > { %736 = vst.msk [vmem:[%s2167_s27 + $0xc] sm:$0xf] %vm732_vm1, %v1524_v38  ;;  %752 = vst.msk [vmem:[%s2167_s27 + $0x4c] sm:$0xf] %vm732_vm1, %v1540_v39  ;;  %v2259_v39 = vsub.s32 %v769_v10, %v771_v11 }
 0x13c   : > { %734 = vst.msk [vmem:[%s2167_s27 + $0x4] sm:$0xf] %vm732_vm1, %v1522_v40  ;;  %750 = vst.msk [vmem:[%s2167_s27 + $0x44] sm:$0xf] %vm732_vm1, %v1538_v41  ;;  %v1580_v42 = vpop.f32.mrb[4].mxu0  ;;  %v1596_v43 = vpop.f32.mrb[4].mxu1 }
 0x13d   : > { %v2194_v44 = vadd.f32 %v1580_v42, %v2132_v17  ;;  %v2197_v45 = vadd.f32 %v1596_v43, %v2132_v17  ;;  %v493_v46 = vpop.f32.mrb[5].mxu0  ;;  %v557_v47 = vpop.f32.mrb[5].mxu1 }
 0x13e   : > { %v2200_v48 = vadd.f32 %v2132_v17, %v493_v46  ;;  %v2203_v49 = vadd.f32 %v2132_v17, %v557_v47  ;;  %v1581_v50 = vpop.f32.mrb[6].mxu0  ;;  %v1597_v51 = vpop.f32.mrb[6].mxu1 }
 0x13f   : > { %v1527_v52 = vpack.c.bf16 %v2194_v44, %v2194_v44  ;;  %v1543_v53 = vpack.c.bf16 %v2197_v45, %v2197_v45  ;;  %v2210_v54 = vadd.f32 %v1581_v50, %v2132_v17  ;;  %v2213_v55 = vadd.f32 %v1597_v51, %v2132_v17  ;;  %v496_v56 = vpop.f32.mrb[7].mxu0  ;;  %v560_v57 = vpop.f32.mrb[7].mxu1 }
 0x140   : > { %v1525_v58 = vpack.c.bf16 %v2200_v48, %v2200_v48  ;;  %v1541_v59 = vpack.c.bf16 %v2203_v49, %v2203_v49  ;;  %v2220_v60 = vadd.f32 %v2132_v17, %v496_v56  ;;  %v2223_v61 = vadd.f32 %v2132_v17, %v560_v57 }
 0x141   : > { %739 = vst.msk [vmem:[%s2167_s27 + $0x18] sm:$0xf] %vm732_vm1, %v1527_v52  ;;  %755 = vst.msk [vmem:[%s2167_s27 + $0x58] sm:$0xf] %vm732_vm1, %v1543_v53  ;;  %v1528_v62 = vpack.c.bf16 %v2210_v54, %v2210_v54  ;;  %v1544_v63 = vpack.c.bf16 %v2213_v55, %v2213_v55 }
 0x142   : > { %737 = vst.msk [vmem:[%s2167_s27 + $0x10] sm:$0xf] %vm732_vm1, %v1525_v58  ;;  %753 = vst.msk [vmem:[%s2167_s27 + $0x50] sm:$0xf] %vm732_vm1, %v1541_v59  ;;  %v1526_v3 = vpack.c.bf16 %v2220_v60, %v2220_v60  ;;  %v1542_v4 = vpack.c.bf16 %v2223_v61, %v2223_v61 }
 0x143   : > { %740 = vst.msk [vmem:[%s2167_s27 + $0x1c] sm:$0xf] %vm732_vm1, %v1528_v62  ;;  %756 = vst.msk [vmem:[%s2167_s27 + $0x5c] sm:$0xf] %vm732_vm1, %v1544_v63 }
 0x144   : > { %738 = vst.msk [vmem:[%s2167_s27 + $0x14] sm:$0xf] %vm732_vm1, %v1526_v3  ;;  %754 = vst.msk [vmem:[%s2167_s27 + $0x54] sm:$0xf] %vm732_vm1, %v1542_v4  ;;  %v1584_v7 = vpop.f32.mrb[8].mxu0  ;;  %v1600_v8 = vpop.f32.mrb[8].mxu1 }
 0x145   : > { %v518_v9 = vadd.f32 %v1584_v7, %v2132_v17  ;;  %v582_v12 = vadd.f32 %v1600_v8, %v2132_v17  ;;  %v509_v13 = vpop.f32.mrb[9].mxu0  ;;  %v573_v14 = vpop.f32.mrb[9].mxu1 }
 0x146   : > { %v510_v15 = vadd.f32 %v2132_v17, %v509_v13  ;;  %v574_v16 = vadd.f32 %v2132_v17, %v573_v14  ;;  %v1585_v18 = vpop.f32.mrb[10].mxu0  ;;  %v1601_v19 = vpop.f32.mrb[10].mxu1 }
 0x147   : > { %v1531_v23 = vpack.c.bf16 %v518_v9, %v518_v9  ;;  %v1472_v26 = vpack.c.bf16 %v518_v9, %v2135_v20  ;;  %v1547_v27 = vpack.c.bf16 %v582_v12, %v582_v12  ;;  %v1476_v28 = vpack.c.bf16 %v582_v12, %v2138_v21  ;;  %v512_v29 = vpop.f32.mrb[11].mxu0  ;;  %v576_v32 = vpop.f32.mrb[11].mxu1 }
 0x148   : > { %v1529_v33 = vpack.c.bf16 %v510_v15, %v510_v15  ;;  %v1464_v34 = vpack.c.bf16 %v510_v15, %v2141_v24  ;;  %v1545_v35 = vpack.c.bf16 %v574_v16, %v574_v16  ;;  %v1468_v38 = vpack.c.bf16 %v574_v16, %v2144_v25 }
 0x149   : > { %743 = vst.msk [vmem:[%s2167_s27 + $0x28] sm:$0xf] %vm732_vm1, %v1531_v23  ;;  %759 = vst.msk [vmem:[%s2167_s27 + $0x68] sm:$0xf] %vm732_vm1, %v1547_v27  ;;  %v2264_v40 = vadd.f32 %v1585_v18, %v2132_v17  ;;  %v2267_v20 = vadd.f32 %v1601_v19, %v2132_v17  ;;  %v2274_v21 = vadd.f32 %v2132_v17, %v512_v29 }
 0x14a   : > { %741 = vst.msk [vmem:[%s2167_s27 + $0x20] sm:$0xf] %vm732_vm1, %v1529_v33  ;;  %757 = vst.msk [vmem:[%s2167_s27 + $0x60] sm:$0xf] %vm732_vm1, %v1545_v35  ;;  %v2277_v24 = vadd.f32 %v2132_v17, %v576_v32  ;;  %v2279_v25 = vsub.s32 %v833_v22, %v771_v11  ;;  %v909_v57 = vrot.slane %v1472_v26, %v2259_v39 }
 0x14b   : > { %v1532_v41 = vpack.c.bf16 %v2264_v40, %v2264_v40  ;;  %v1473_v42 = vpack.c.bf16 %v2264_v40, %v2151_v30  ;;  %v1548_v43 = vpack.c.bf16 %v2267_v20, %v2267_v20  ;;  %v1477_v46 = vpack.c.bf16 %v2267_v20, %v2154_v31 }
 0x14c   : > { %v1530_v47 = vpack.c.bf16 %v2274_v21, %v2274_v21  ;;  %v1465_v50 = vpack.c.bf16 %v2274_v21, %v2161_v36  ;;  %v1546_v51 = vpack.c.bf16 %v2277_v24, %v2277_v24  ;;  %v1469_v52 = vpack.c.bf16 %v2277_v24, %v2164_v37  ;;  %v1588_v53 = vpop.f32.mrb[12].mxu0  ;;  %v1604_v56 = vpop.f32.mrb[12].mxu1 }
 0x14d   : > { %v941_v58 = vrot.slane %v1476_v28, %v2259_v39  ;;  %744 = vst.msk [vmem:[%s2167_s27 + $0x2c] sm:$0xf] %vm732_vm1, %v1532_v41  ;;  %760 = vst.msk [vmem:[%s2167_s27 + $0x6c] sm:$0xf] %vm732_vm1, %v1548_v43  ;;  %v534_v59 = vadd.f32 %v1588_v53, %v2132_v17  ;;  %v598_v62 = vadd.f32 %v1604_v56, %v2132_v17  ;;  %v525_v63 = vpop.f32.mrb[13].mxu0  ;;  %v589_v0 = vpop.f32.mrb[13].mxu1 }
 0x14e   : > { %v773_v1 = vrot.slane %v1464_v34, %v2259_v39  ;;  %v805_v2 = vrot.slane %v1468_v38, %v2259_v39  ;;  %742 = vst.msk [vmem:[%s2167_s27 + $0x24] sm:$0xf] %vm732_vm1, %v1530_v47  ;;  %758 = vst.msk [vmem:[%s2167_s27 + $0x64] sm:$0xf] %vm732_vm1, %v1546_v51  ;;  %v526_v3 = vadd.f32 %v2132_v17, %v525_v63  ;;  %v1589_v5 = vpop.f32.mrb[14].mxu0  ;;  %v1605_v6 = vpop.f32.mrb[14].mxu1 }
 0x14f   : > { %v590_v4 = vadd.f32 %v2132_v17, %v589_v0  ;;  %v1535_v7 = vpack.c.bf16 %v534_v59, %v534_v59  ;;  %v1474_v8 = vpack.c.bf16 %v534_v59, %v2194_v44  ;;  %v1551_v9 = vpack.c.bf16 %v598_v62, %v598_v62  ;;  %v528_v11 = vpop.f32.mrb[15].mxu0  ;;  %v592_v12 = vpop.f32.mrb[15].mxu1 }
 0x150   : > { %v1478_v10 = vpack.c.bf16 %v598_v62, %v2197_v45  ;;  %v1533_v13 = vpack.c.bf16 %v526_v3, %v526_v3  ;;  %v1466_v14 = vpack.c.bf16 %v526_v3, %v2200_v48  ;;  %v2324_v19 = vadd.f32 %v1589_v5, %v2132_v17 }
 0x151   : > { %v1549_v15 = vpack.c.bf16 %v590_v4, %v590_v4  ;;  %v1470_v16 = vpack.c.bf16 %v590_v4, %v2203_v49  ;;  %747 = vst.msk [vmem:[%s2167_s27 + $0x38] sm:$0xf] %vm732_vm1, %v1535_v7  ;;  %v925_v18 = vrot.slane %v1474_v8, %v2259_v39  ;;  %763 = vst.msk [vmem:[%s2167_s27 + $0x78] sm:$0xf] %vm732_vm1, %v1551_v9 }
 0x152   : > { %v957_v44 = vrot.slane %v1478_v10, %v2259_v39  ;;  %v2327_v45 = vadd.f32 %v1605_v6, %v2132_v17  ;;  %745 = vst.msk [vmem:[%s2167_s27 + $0x30] sm:$0xf] %vm732_vm1, %v1533_v13  ;;  %v789_v48 = vrot.slane %v1466_v14, %v2259_v39  ;;  %v2336_v22 = vadd.f32 %v2132_v17, %v528_v11 }
 0x153   : > { %761 = vst.msk [vmem:[%s2167_s27 + $0x70] sm:$0xf] %vm732_vm1, %v1549_v15  ;;  %v821_v49 = vrot.slane %v1470_v16, %v2259_v39  ;;  %v2339_v23 = vadd.f32 %v2132_v17, %v592_v12  ;;  %v965_v26 = vcombine.low %v909_v57, %v925_v18  ;;  %v966_v27 = vcombine.high %v909_v57, %v925_v18 }
 0x154   : > { %v997_v28 = vcombine.low %v941_v58, %v957_v44  ;;  %v998_v29 = vcombine.high %v941_v58, %v957_v44  ;;  %v829_v32 = vcombine.low %v773_v1, %v789_v48  ;;  %v830_v33 = vcombine.high %v773_v1, %v789_v48 }
 0x155   : > { %v861_v34 = vcombine.low %v805_v2, %v821_v49  ;;  %v862_v35 = vcombine.high %v805_v2, %v821_v49  ;;  %v973_v38 = vrot.slane %v965_v26, %v2279_v25  ;;  %v980_v41 = vrot.slane %v966_v27, %v2279_v25 }
 0x156   : > { %v1005_v43 = vrot.slane %v997_v28, %v2279_v25  ;;  %v1012_v47 = vrot.slane %v998_v29, %v2279_v25  ;;  %v837_v51 = vrot.slane %v829_v32, %v2279_v25  ;;  %v844_v17 = vrot.slane %v830_v33, %v2279_v25 }
 0x157   : > { %v869_v53 = vrot.slane %v861_v34, %v2279_v25  ;;  %v876_v56 = vrot.slane %v862_v35, %v2279_v25  ;;  %v780_v30 = vrot.slane %v1465_v50, %v2259_v39  ;;  %v812_v31 = vrot.slane %v1469_v52, %v2259_v39 }
 0x158   : > { %v1029_v57 = vcombine.low %v973_v38, %v1005_v43  ;;  %v1030_v58 = vcombine.high %v973_v38, %v1005_v43  ;;  %v1031_v59 = vcombine.low %v980_v41, %v1012_v47  ;;  %v1032_v62 = vcombine.high %v980_v41, %v1012_v47 }
 0x159   : > { %v893_v63 = vcombine.low %v837_v51, %v869_v53  ;;  %v894_v0 = vcombine.high %v837_v51, %v869_v53  ;;  %v895_v1 = vcombine.low %v844_v17, %v876_v56  ;;  %v896_v2 = vcombine.high %v844_v17, %v876_v56 }
 0x15a   : > { %v1041_v3 = vshrl.u32 %v1029_v57, 16  ;;  %v1047_v4 = vshrl.u32 %v1030_v58, 16  ;;  %v1053_v5 = vshrl.u32 %v1031_v59, 16  ;;  %v1059_v6 = vshrl.u32 %v1032_v62, 16 }
 0x15b   : > { %v1039_v7 = vpack.i.b16 %v1029_v57, %v893_v63  ;;  %v1040_v8 = vshrl.u32 %v893_v63, 16  ;;  %v1045_v9 = vpack.i.b16 %v1030_v58, %v894_v0  ;;  %v1046_v10 = vshrl.u32 %v894_v0, 16 }
 0x15c   : > { %v1051_v11 = vpack.i.b16 %v1031_v59, %v895_v1  ;;  %v1052_v12 = vshrl.u32 %v895_v1, 16  ;;  %v1057_v13 = vpack.i.b16 %v1032_v62, %v896_v2  ;;  %v1058_v14 = vshrl.u32 %v896_v2, 16 }
 0x15d   : > { %v1042_v15 = vpack.i.b16 %v1041_v3, %v1040_v8  ;;  %v1048_v16 = vpack.i.b16 %v1047_v4, %v1046_v10  ;;  %v1480_v18 = vcombine.low %v1039_v7, %v1039_v7  ;;  %v1481_v44 = vcombine.high %v1039_v7, %v1039_v7 }
 0x15e   : > { %v1054_v48 = vpack.i.b16 %v1053_v5, %v1052_v12  ;;  %v1060_v49 = vpack.i.b16 %v1059_v6, %v1058_v14  ;;  %v1484_v26 = vcombine.low %v1045_v9, %v1045_v9  ;;  %v1485_v27 = vcombine.high %v1045_v9, %v1045_v9 }
 0x15f   : > { %v1482_v28 = vcombine.low %v1042_v15, %v1042_v15  ;;  %v1483_v29 = vcombine.high %v1042_v15, %v1042_v15  ;;  %v1486_v32 = vcombine.low %v1048_v16, %v1048_v16  ;;  %v1487_v33 = vcombine.high %v1048_v16, %v1048_v16  ;;  %1181 = vst.msk [vmem:[%s2350_s14] sm:$0xf] %vm732_vm1, %v1480_v18 }
 0x160   : > { %1182 = vst.msk [vmem:[%s2350_s14 + $0x4] sm:$0xf] %vm732_vm1, %v1481_v44  ;;  %v1488_v34 = vcombine.low %v1051_v11, %v1051_v11  ;;  %v1489_v35 = vcombine.high %v1051_v11, %v1051_v11  ;;  %v1490_v38 = vcombine.low %v1054_v48, %v1054_v48  ;;  %v1491_v41 = vcombine.high %v1054_v48, %v1054_v48 }
 0x161   : > { %1185 = vst.msk [vmem:[%s2350_s14 + $0x10] sm:$0xf] %vm732_vm1, %v1484_v26  ;;  %1186 = vst.msk [vmem:[%s2350_s14 + $0x14] sm:$0xf] %vm732_vm1, %v1485_v27  ;;  %v1492_v43 = vcombine.low %v1057_v13, %v1057_v13  ;;  %v1493_v47 = vcombine.high %v1057_v13, %v1057_v13  ;;  %v1494_v51 = vcombine.low %v1060_v49, %v1060_v49 }
 0x162   : > { %v1495_v17 = vcombine.high %v1060_v49, %v1060_v49  ;;  %1183 = vst.msk [vmem:[%s2350_s14 + $0x8] sm:$0xf] %vm732_vm1, %v1482_v28  ;;  %1184 = vst.msk [vmem:[%s2350_s14 + $0xc] sm:$0xf] %vm732_vm1, %v1483_v29  ;;  %v1536_v53 = vpack.c.bf16 %v2324_v19, %v2324_v19  ;;  %v1475_v56 = vpack.c.bf16 %v2324_v19, %v2210_v54 }
 0x163   : > { %1187 = vst.msk [vmem:[%s2350_s14 + $0x18] sm:$0xf] %vm732_vm1, %v1486_v32  ;;  %1188 = vst.msk [vmem:[%s2350_s14 + $0x1c] sm:$0xf] %vm732_vm1, %v1487_v33  ;;  %v1552_v57 = vpack.c.bf16 %v2327_v45, %v2327_v45  ;;  %v1479_v58 = vpack.c.bf16 %v2327_v45, %v2213_v55  ;;  %v1534_v54 = vpack.c.bf16 %v2336_v22, %v2336_v22 }
 0x164   : > { %1189 = vst.msk [vmem:[%s2350_s14 + $0x20] sm:$0xf] %vm732_vm1, %v1488_v34  ;;  %1190 = vst.msk [vmem:[%s2350_s14 + $0x24] sm:$0xf] %vm732_vm1, %v1489_v35  ;;  %v1467_v55 = vpack.c.bf16 %v2336_v22, %v2220_v60  ;;  %v1550_v19 = vpack.c.bf16 %v2339_v23, %v2339_v23  ;;  %v1471_v45 = vpack.c.bf16 %v2339_v23, %v2223_v61 }
 0x165   : > { %1191 = vst.msk [vmem:[%s2350_s14 + $0x28] sm:$0xf] %vm732_vm1, %v1490_v38  ;;  %1192 = vst.msk [vmem:[%s2350_s14 + $0x2c] sm:$0xf] %vm732_vm1, %v1491_v41  ;;  %v916_v59 = vrot.slane %v1473_v42, %v2259_v39  ;;  %v948_v62 = vrot.slane %v1477_v46, %v2259_v39  ;;  %v932_v60 = vrot.slane %v1475_v56, %v2259_v39 }
 0x166   : > { %1193 = vst.msk [vmem:[%s2350_s14 + $0x30] sm:$0xf] %vm732_vm1, %v1492_v43  ;;  %1194 = vst.msk [vmem:[%s2350_s14 + $0x34] sm:$0xf] %vm732_vm1, %v1493_v47  ;;  %v964_v61 = vrot.slane %v1479_v58, %v2259_v39  ;;  %v796_v40 = vrot.slane %v1467_v55, %v2259_v39  ;;  %v828_v20 = vrot.slane %v1471_v45, %v2259_v39 }
 0x167   : > { %1195 = vst.msk [vmem:[%s2350_s14 + $0x38] sm:$0xf] %vm732_vm1, %v1494_v51  ;;  %1196 = vst.msk [vmem:[%s2350_s14 + $0x3c] sm:$0xf] %vm732_vm1, %v1495_v17  ;;  %v981_v42 = vcombine.low %v916_v59, %v932_v60  ;;  %v982_v46 = vcombine.high %v916_v59, %v932_v60 }
 0x168   : > { %748 = vst.msk [vmem:[%s2167_s27 + $0x3c] sm:$0xf] %vm732_vm1, %v1536_v53  ;;  %764 = vst.msk [vmem:[%s2167_s27 + $0x7c] sm:$0xf] %vm732_vm1, %v1552_v57  ;;  %v1013_v22 = vcombine.low %v948_v62, %v964_v61  ;;  %v1014_v23 = vcombine.high %v948_v62, %v964_v61 }
 0x169   : > { %746 = vst.msk [vmem:[%s2167_s27 + $0x34] sm:$0xf] %vm732_vm1, %v1534_v54  ;;  %762 = vst.msk [vmem:[%s2167_s27 + $0x74] sm:$0xf] %vm732_vm1, %v1550_v19 }
 0x16a   : > { %1780 = shalt.err (!%p1777_p5)
}
 0x16b   : > { %s1781_s24 = scalar_lea.hbm %s2391_s29, 2048  ;;  %s1785_s27 = scalar_lea.hbm %s2569_s3, 4096 }
 0x16c   : > { %p1782_p9 = scmp.ne.s32.totalorder %s2391_s29, %s1781_s24  ;;  %p1786_p3 = scmp.lt.u32.totalorder %s2391_s29, %s2569_s3 }
 0x16d   : > { %p1787_p7 = scmp.lt.u32.totalorder %s1785_s27, %s1781_s24  ;;  %p1789_p4 = scmp.lt.u32.totalorder %s1781_s24, %s2391_s29 }
 0x16e   : > { %p1783_p1 = pnand %p1782_p9, %p2021_p10 }
 0x16f   : > { %p1788_p13 = por %p1787_p7, %p1786_p3 }
 0x170   : > { %p1784_p2 = pneg %p1783_p1 }
 0x171   : > { %p1790_p6 = por %p1789_p4, %p1788_p13 }
 0x173   : > { %p1791_p8 = pnand %p1790_p6, %p1784_p2 }
 0x175   : > { %1794 = shalt.err (!%p1791_p8)
}
 0x176   : > { %s1894_s11 = smov 64   ;;  %s1895_s13 = smov 4   ;;  %v845_v36 = vcombine.low %v780_v30, %v796_v40  ;;  %v846_v37 = vcombine.high %v780_v30, %v796_v40  ;;  %v877_v39 = vcombine.low %v812_v31, %v828_v20  ;;  %v878_v21 = vcombine.high %v812_v31, %v828_v20 }
 0x177   : > { %1614 = dma.vmem_to_hbm [thread:$0]  (%p2021_p10), %s2393_s22, 2048, %s2391_s29, %s1214_s9, %s1894_s11, %s1894_s11, %s1895_s13   ;;  %v989_v24 = vrot.slane %v981_v42, %v2279_v25  ;;  %v996_v50 = vrot.slane %v982_v46, %v2279_v25  ;;  %v1021_v52 = vrot.slane %v1013_v22, %v2279_v25  ;;  %v1028_v63 = vrot.slane %v1014_v23, %v2279_v25 }
 0x178   : > { %v853_v0 = vrot.slane %v845_v36, %v2279_v25  ;;  %v860_v1 = vrot.slane %v846_v37, %v2279_v25  ;;  %v885_v2 = vrot.slane %v877_v39, %v2279_v25  ;;  %v892_v3 = vrot.slane %v878_v21, %v2279_v25  ;;  %s1253_s22 = sshll.u32 %s2350_s14, 4  ;;  %s2496_s7 = scalar_lea.hbm %s2570_s4, %s1553_s21  ;;  %s2498_s22 = int_to_ptr.vmem [resolvable:$true] %s1253_s22 }
 0x179   : > { %v1033_v4 = vcombine.low %v989_v24, %v1021_v52  ;;  %v1034_v5 = vcombine.high %v989_v24, %v1021_v52  ;;  %v1035_v6 = vcombine.low %v996_v50, %v1028_v63  ;;  %v1036_v7 = vcombine.high %v996_v50, %v1028_v63  ;;  %s1219_s18 = scalar_lea.sflag [#allocation9], %s2080_s12  ;;  %s1795_s21 = scalar_lea.vmem %s2498_s22, 2048 }
 0x17a   : > { %v897_v8 = vcombine.low %v853_v0, %v885_v2  ;;  %v898_v9 = vcombine.high %v853_v0, %v885_v2  ;;  %v899_v10 = vcombine.low %v860_v1, %v892_v3  ;;  %v900_v11 = vcombine.high %v860_v1, %v892_v3  ;;  %p1796_p12 = scmp.ne.s32.totalorder %s2498_s22, %s1795_s21  ;;  %s1896_s8 = smov [#allocation8]  }
 0x17b   : > { %v1065_v12 = vshrl.u32 %v1033_v4, 16  ;;  %v1071_v13 = vshrl.u32 %v1034_v5, 16  ;;  %v1077_v14 = vshrl.u32 %v1035_v6, 16  ;;  %v1083_v15 = vshrl.u32 %v1036_v7, 16  ;;  %s1799_s24 = sshll.u32 %s1896_s8, 4  ;;  %s1800_s24 = int_to_ptr.vmem [resolvable:$false] %s1799_s24 }
 0x17c   : > { %v1063_v16 = vpack.i.b16 %v1033_v4, %v897_v8  ;;  %v1064_v18 = vshrl.u32 %v897_v8, 16  ;;  %v1069_v44 = vpack.i.b16 %v1034_v5, %v898_v9  ;;  %v1070_v48 = vshrl.u32 %v898_v9, 16  ;;  %p1797_p11 = pnand %p1796_p12, %p2021_p10  ;;  %s1801_s23 = scalar_lea.vmem %s1800_s24, 4096 }
 0x17d   : > { %v1075_v49 = vpack.i.b16 %v1035_v6, %v899_v10  ;;  %v1076_v26 = vshrl.u32 %v899_v10, 16  ;;  %v1081_v25 = vpack.i.b16 %v1036_v7, %v900_v11  ;;  %v1082_v27 = vshrl.u32 %v900_v11, 16  ;;  %p1802_p5 = scmp.lt.s32.totalorder %s2498_s22, %s1800_s24  ;;  %p1803_p9 = scmp.lt.s32.totalorder %s1801_s23, %s1795_s21 }
 0x17e   : > { %v1066_v28 = vpack.i.b16 %v1065_v12, %v1064_v18  ;;  %v1072_v29 = vpack.i.b16 %v1071_v13, %v1070_v48  ;;  %v1496_v32 = vcombine.low %v1063_v16, %v1063_v16  ;;  %v1497_v33 = vcombine.high %v1063_v16, %v1063_v16  ;;  %p1798_p0 = pneg %p1797_p11 }
 0x17f   : > { %v1078_v34 = vpack.i.b16 %v1077_v14, %v1076_v26  ;;  %v1084_v35 = vpack.i.b16 %v1083_v15, %v1082_v27  ;;  %v1500_v38 = vcombine.low %v1069_v44, %v1069_v44  ;;  %v1501_v41 = vcombine.high %v1069_v44, %v1069_v44  ;;  %p1804_p1 = por %p1803_p9, %p1802_p5 }
 0x180   : > { %v1498_v43 = vcombine.low %v1066_v28, %v1066_v28  ;;  %v1499_v47 = vcombine.high %v1066_v28, %v1066_v28  ;;  %v1502_v51 = vcombine.low %v1072_v29, %v1072_v29  ;;  %v1503_v17 = vcombine.high %v1072_v29, %v1072_v29  ;;  %1197 = vst.msk [vmem:[%s2350_s14 + $0x40] sm:$0xf] %vm732_vm1, %v1496_v32 }
 0x181   : > { %1198 = vst.msk [vmem:[%s2350_s14 + $0x44] sm:$0xf] %vm732_vm1, %v1497_v33  ;;  %v1504_v53 = vcombine.low %v1075_v49, %v1075_v49  ;;  %v1505_v56 = vcombine.high %v1075_v49, %v1075_v49  ;;  %v1506_v57 = vcombine.low %v1078_v34, %v1078_v34  ;;  %v1507_v58 = vcombine.high %v1078_v34, %v1078_v34  ;;  %p1805_p2 = pnand %p1804_p1, %p1798_p0 }
 0x182   : > { %1201 = vst.msk [vmem:[%s2350_s14 + $0x50] sm:$0xf] %vm732_vm1, %v1500_v38  ;;  %1202 = vst.msk [vmem:[%s2350_s14 + $0x54] sm:$0xf] %vm732_vm1, %v1501_v41  ;;  %v1508_v54 = vcombine.low %v1081_v25, %v1081_v25  ;;  %v1509_v55 = vcombine.high %v1081_v25, %v1081_v25  ;;  %v1510_v19 = vcombine.low %v1084_v35, %v1084_v35 }
 0x183   : > { %v1511_v45 = vcombine.high %v1084_v35, %v1084_v35  ;;  %1199 = vst.msk [vmem:[%s2350_s14 + $0x48] sm:$0xf] %vm732_vm1, %v1498_v43  ;;  %1200 = vst.msk [vmem:[%s2350_s14 + $0x4c] sm:$0xf] %vm732_vm1, %v1499_v47 }
 0x184   : > { %1203 = vst.msk [vmem:[%s2350_s14 + $0x58] sm:$0xf] %vm732_vm1, %v1502_v51  ;;  %1204 = vst.msk [vmem:[%s2350_s14 + $0x5c] sm:$0xf] %vm732_vm1, %v1503_v17 }
 0x185   : > { %1205 = vst.msk [vmem:[%s2350_s14 + $0x60] sm:$0xf] %vm732_vm1, %v1504_v53  ;;  %1206 = vst.msk [vmem:[%s2350_s14 + $0x64] sm:$0xf] %vm732_vm1, %v1505_v56 }
 0x186   : > { %1207 = vst.msk [vmem:[%s2350_s14 + $0x68] sm:$0xf] %vm732_vm1, %v1506_v57  ;;  %1208 = vst.msk [vmem:[%s2350_s14 + $0x6c] sm:$0xf] %vm732_vm1, %v1507_v58 }
 0x187   : > { %1209 = vst.msk [vmem:[%s2350_s14 + $0x70] sm:$0xf] %vm732_vm1, %v1508_v54  ;;  %1210 = vst.msk [vmem:[%s2350_s14 + $0x74] sm:$0xf] %vm732_vm1, %v1509_v55 }
 0x188   : > { %1211 = vst.msk [vmem:[%s2350_s14 + $0x78] sm:$0xf] %vm732_vm1, %v1510_v19  ;;  %1212 = vst.msk [vmem:[%s2350_s14 + $0x7c] sm:$0xf] %vm732_vm1, %v1511_v45 }
 0x189   : > { %1808 = shalt.err (!%p1805_p2)
}
 0x18a   : > { %s1809_s14 = scalar_lea.hbm %s2496_s7, 2048  ;;  %s1813_s28 = scalar_lea.hbm %s2570_s4, 4096 }
 0x18b   : > { %p1810_p3 = scmp.ne.s32.totalorder %s2496_s7, %s1809_s14  ;;  %p1814_p4 = scmp.lt.u32.totalorder %s2496_s7, %s2570_s4 }
 0x18c   : > { %p1815_p6 = scmp.lt.u32.totalorder %s1813_s28, %s1809_s14  ;;  %p1817_p12 = scmp.lt.u32.totalorder %s1809_s14, %s2496_s7 }
 0x18d   : > { %p1811_p7 = pnand %p1810_p3, %p2021_p10 }
 0x18e   : > { %p1816_p8 = por %p1815_p6, %p1814_p4 }
 0x18f   : > { %p1812_p13 = pneg %p1811_p7 }
 0x190   : > { %p1818_p11 = por %p1817_p12, %p1816_p8 }
 0x192   : > { %p1819_p0 = pnand %p1818_p11, %p1812_p13 }
 0x194   : > { %1822 = shalt.err (!%p1819_p0)
}
 0x195   : > { %1615 = dma.vmem_to_hbm [thread:$0]  (%p2021_p10), %s2498_s22, 2048, %s2496_s7, %s1219_s18, %s1894_s11, %s1894_s11, %s1895_s13  }
 0x196 PF: > { %s1268_s9 = sand.u32 1, %s1865_s15   ;;  %p2588_p5 = scmp.ne.s32.totalorder %s2578_s26, 0 }
 0x197   : > { %p2589_p9 = scmp.ge.s32.totalorder %s1885_s20, 2  ;;  %s1269_s21 = scalar_lea.sflag [#allocation4], %s1268_s9 }
 0x199   : > { %p1627_p1 = pnand %p2589_p9, %p2588_p5 }
 0x19b   : > { %1856 = dma.done.wait (!%p1627_p1), %s1269_s21, 2048  }
 0x19c   : > { %1858 = vsyncadd (!%p1627_p1), %s1269_s21, 4294965248  ;;  %s1278_s30 = scalar_lea.sflag [#allocation9], %s1268_s9 }
 0x19d   : > { %1860 = dma.done.wait (!%p1627_p1), %s1278_s30, 2048  }
 0x19e   : > { %1862 = vsyncadd (!%p1627_p1), %s1278_s30, 4294965248  ;;  %s25_s20 = sadd.s32 1, %s1885_s20   ;;  %s2590_s15 = smov %s1869_s16 }
 0x19f   : > { %p22_p2 = scmp.ge.s32.totalorder %s25_s20, 4   ;;  %s2591_s16 = smov %s1873_s17 }
 0x1a0   : > { %s2592_s17 = smov %s2030_s10  ;;  %s2593_s18 = smov %s1881_s19 }
 0x1a1   : > { %s2594_s19 = smov %s2596_s5  ;;  %24 = sbr.rel (!%p22_p2) target bundleno = 9 (0x9), region = 98 }
 0x1a8   :  { %1283 = vsyncpa [#allocation3], 1 }
 0x1a9   :  { %1285 = vsyncpa [#allocation3 + $0x1], 1 }
 0x1aa   :  { %1286 = vsyncpa [#allocation6], 1 }
 0x1ab   :  { %1287 = vsyncpa [#allocation4], 1 }
 0x1ac   :  { %1289 = vsyncpa [#allocation4 + $0x1], 1 }
 0x1ad   :  { %1290 = vsyncpa [#allocation9], 1 }
 0x1ae   :  { %1292 = vsyncpa [#allocation9 + $0x1], 1 }

</bundles_post_ra>
